<compile_context>
chip_gen: v5e
topology: v5e:2x2
jax: 0.10.0
libtpu: 0.0.40
codegen_flags: <defaults>
</compile_context>

<pallas_src>
import functools

import jax
import jax.numpy as jnp
from jax.experimental import pallas as pl
from jax.experimental.pallas import tpu as pltpu


def _ce_kernel(labels_ref, logits_ref, out_ref, m_ref, l_ref, ll_ref, *,
               vocab_size, vocab_tile):
    """Grid = (batch, seq_tiles, vocab_tiles); vocab axis is the reduction axis.

    labels_ref: (1, TS, 1)  int32   shifted labels; negative => ignored row
    logits_ref: (1, TS, TV) any-f   logits tile (upcast to f32 in-kernel)
    out_ref:    (1, TS, 1)  f32     per-row loss (written on last vocab step)
    m_ref/l_ref/ll_ref: (TS, 1) f32 online-logsumexp state (max, sumexp, label logit)
    """
    vt = pl.program_id(2)
    n_vt = pl.num_programs(2)

    @pl.when(vt == 0)
    def _():
        m_ref[...] = jnp.full(m_ref.shape, -jnp.inf, dtype=m_ref.dtype)
        l_ref[...] = jnp.zeros_like(l_ref)
        ll_ref[...] = jnp.zeros_like(ll_ref)

    labels = labels_ref[0]                         # (TS, 1) int32
    x = logits_ref[0].astype(jnp.float32)          # (TS, TV) f32
    ts, tv = x.shape

    row_valid = labels >= 0                        # (TS, 1) bool

    # Global vocab ids covered by this tile.
    lane_ids = jax.lax.broadcasted_iota(jnp.int32, (ts, tv), 1) + vt * vocab_tile
    lane_valid = lane_ids < vocab_size             # (TS, TV) bool

    # Mask BEFORE max/exp: out-of-vocab lanes -> -inf, invalid rows -> all zeros.
    # (jnp.where never propagates NaN/Inf garbage from partial edge blocks.)
    x = jnp.where(lane_valid, x, -jnp.inf)
    x = jnp.where(row_valid, x, 0.0)

    # Online (streaming) logsumexp over the vocab axis.
    tile_max = jnp.max(x, axis=-1, keepdims=True)              # (TS, 1)
    m_new = jnp.maximum(m_ref[...], tile_max)
    alpha = jnp.exp(m_ref[...] - m_new)
    l_ref[...] = alpha * l_ref[...] + jnp.sum(jnp.exp(x - m_new),
                                              axis=-1, keepdims=True)
    m_ref[...] = m_new

    # Logit at the label index (at most one hit across all vocab tiles).
    ll_ref[...] += jnp.sum(jnp.where(lane_ids == labels, x, 0.0),
                           axis=-1, keepdims=True)

    @pl.when(vt == n_vt - 1)
    def _():
        valid_f = row_valid.astype(jnp.float32)
        out_ref[0] = (m_ref[...] + jnp.log(l_ref[...]) - ll_ref[...]) * valid_f


@functools.partial(jax.jit, static_argnames=("seq_tile", "vocab_tile"))
def gpt_lm_loss(logits, labels, seq_tile=256, vocab_tile=2048):
    """Equivalent of GPTLMLoss.forward: mean CE of logits[..., :-1, :] vs labels[..., 1:]."""
    B, S, V = logits.shape
    assert labels.shape == (B, S)
    assert S >= 2
    assert seq_tile % 8 == 0 and vocab_tile % 128 == 0

    # Tile sizes obeying the TPU (8, 128) block constraints (or full-dim blocks).
    ts = S if S <= seq_tile else seq_tile
    tv = V if V <= vocab_tile else vocab_tile
    n_seq_tiles = pl.cdiv(S - 1, ts)
    n_vocab_tiles = pl.cdiv(V, tv)
    s_pad = n_seq_tiles * ts

    # Only the tiny labels array is shifted/padded in JAX (padding label -100 =>
    # ignored row; this also masks the non-shifted position S-1 and any garbage
    # rows of a partial edge seq-block of the logits).
    shift_labels = labels[:, 1:].astype(jnp.int32)                       # (B, S-1)
    labels_padded = jnp.pad(shift_labels, ((0, 0), (0, s_pad - (S - 1))),
                            constant_values=-100).reshape(B, s_pad, 1)

    n_rows = B * (S - 1)
    itemsize = jnp.dtype(logits.dtype).itemsize

    kernel = functools.partial(_ce_kernel, vocab_size=V, vocab_tile=tv)

    per_row = pl.pallas_call(
        kernel,
        out_shape=jax.ShapeDtypeStruct((B, s_pad, 1), jnp.float32),
        grid_spec=pltpu.PrefetchScalarGridSpec(
            num_scalar_prefetch=0,
            grid=(B, n_seq_tiles, n_vocab_tiles),
            in_specs=[
                pl.BlockSpec((1, ts, 1), lambda b, st, vt: (b, st, 0)),
                pl.BlockSpec((1, ts, tv), lambda b, st, vt: (b, st, vt)),
            ],
            out_specs=pl.BlockSpec((1, ts, 1), lambda b, st, vt: (b, st, 0)),
            scratch_shapes=[
                pltpu.VMEM((ts, 1), jnp.float32),   # running max
                pltpu.VMEM((ts, 1), jnp.float32),   # running sum-exp
                pltpu.VMEM((ts, 1), jnp.float32),   # label logit
            ],
        ),
        compiler_params=pltpu.CompilerParams(
            dimension_semantics=("parallel", "parallel", "arbitrary"),
            vmem_limit_bytes=32 * 1024 * 1024,
        ),
        cost_estimate=pl.CostEstimate(
            flops=5 * n_rows * V,
            transcendentals=n_rows * V,
            bytes_accessed=B * S * V * itemsize + B * S * 4 + B * s_pad * 4,
        ),
    )(labels_padded, logits)

    # Invalid rows contribute exactly 0; mean over non-ignored target tokens.
    # TODO(synk): PyTorch only ignores label == -100; we treat any negative label as ignored.
    loss_sum = jnp.sum(per_row)
    denom = jnp.sum((shift_labels >= 0).astype(jnp.float32))
    return loss_sum / denom


def _reference(logits, labels):
    shift_logits = logits[:, :-1, :].astype(jnp.float32)
    shift_labels = labels[:, 1:].astype(jnp.int32)
    logprobs = jax.nn.log_softmax(shift_logits, axis=-1)
    nll = -jnp.take_along_axis(logprobs, shift_labels[..., None], axis=-1)[..., 0]
    return jnp.mean(nll)


if __name__ == "__main__":
    key = jax.random.PRNGKey(0)
    k1, k2, k3, k4 = jax.random.split(key, 4)

    # Test 1: small shapes, single vocab tile, f32 logits.
    B, S, V = 2, 8, 128
    logits = jax.random.normal(k1, (B, S, V), dtype=jnp.float32)
    labels = jax.random.randint(k2, (B, S), 0, V, dtype=jnp.int32)
    loss = gpt_lm_loss(logits, labels)
    jax.block_until_ready(loss)
    ref = _reference(logits, labels)
    assert jnp.allclose(loss, ref, atol=1e-5, rtol=1e-5), (loss, ref)

    # Test 2: bf16 logits stay bf16 in HBM; kernel upcasts per tile.
    logits_bf16 = logits.astype(jnp.bfloat16)
    loss_bf16 = gpt_lm_loss(logits_bf16, labels)
    jax.block_until_ready(loss_bf16)
    ref_bf16 = _reference(logits_bf16.astype(jnp.float32), labels)
    assert jnp.allclose(loss_bf16, ref_bf16, atol=1e-4, rtol=1e-4), (loss_bf16, ref_bf16)

    # Test 3: exercises the online logsumexp (3 vocab tiles) and a partial
    # seq-edge block (S-1 = 10 rows across two 8-row tiles).
    B2, S2, V2 = 2, 11, 384
    logits2 = jax.random.normal(k3, (B2, S2, V2), dtype=jnp.float32)
    labels2 = jax.random.randint(k4, (B2, S2), 0, V2, dtype=jnp.int32)
    loss2 = gpt_lm_loss(logits2, labels2, seq_tile=8, vocab_tile=128)
    jax.block_until_ready(loss2)
    ref2 = _reference(logits2, labels2)
    assert jnp.allclose(loss2, ref2, atol=1e-5, rtol=1e-5), (loss2, ref2)

    print("KERNEL_OK")
</pallas_src>

<mosaic_0001>
module attributes {stable_mosaic.version = 11 : i64} {
  func.func @_ce_kernel(%arg0: i32, %arg1: i32, %arg2: i32, %arg3: memref<1x8x1xi32, #tpu.memory_space<vmem>>, %arg4: memref<1x8x128xf32, #tpu.memory_space<vmem>>, %arg5: memref<1x8x1xf32, #tpu.memory_space<vmem>>, %arg6: memref<8x1xf32, #tpu.memory_space<vmem>>, %arg7: memref<8x1xf32, #tpu.memory_space<vmem>>, %arg8: memref<8x1xf32, #tpu.memory_space<vmem>>) attributes {dimension_semantics = [#tpu.dimension_semantics<parallel>, #tpu.dimension_semantics<parallel>, #tpu.dimension_semantics<arbitrary>], iteration_bounds = array<i64: 2, 1, 1>, scalar_prefetch = 0 : i64, scratch_operands = 3 : i64, tpu.core_type = #tpu.core_type<tc>, window_params = [{transform_indices = @transform_0, window_bounds = array<i64: 1, 8, 1>}, {transform_indices = @transform_1, window_bounds = array<i64: 1, 8, 128>}, {transform_indices = @transform_2, window_bounds = array<i64: 1, 8, 1>}]} {
    %c0_i32 = arith.constant 0 : i32
    %0 = arith.cmpi eq, %arg2, %c0_i32 : i32
    %1 = arith.extui %0 : i1 to i32
    %c0_i32_0 = arith.constant 0 : i32
    %2 = arith.cmpi ne, %1, %c0_i32_0 : i32
    scf.if %2 {
      %cst_29 = arith.constant 0xFF800000 : f32
      %50 = vector.broadcast %cst_29 : f32 to vector<8x1xf32>
      %c0_30 = arith.constant 0 : index
      %c0_31 = arith.constant 0 : index
      %51 = vector.load %arg6[%c0_30, %c0_31] : memref<8x1xf32, #tpu.memory_space<vmem>>, vector<8x1xf32>
      tpu.vector_store %arg6[%c0_30, %c0_31], %50 {strides = array<i32>} : memref<8x1xf32, #tpu.memory_space<vmem>>, vector<8x1xf32>,
      %cst_32 = arith.constant 0.000000e+00 : f32
      %52 = vector.broadcast %cst_32 : f32 to vector<8x1xf32>
      %c0_33 = arith.constant 0 : index
      %c0_34 = arith.constant 0 : index
      %53 = vector.load %arg7[%c0_33, %c0_34] : memref<8x1xf32, #tpu.memory_space<vmem>>, vector<8x1xf32>
      tpu.vector_store %arg7[%c0_33, %c0_34], %52 {strides = array<i32>} : memref<8x1xf32, #tpu.memory_space<vmem>>, vector<8x1xf32>,
      %cst_35 = arith.constant 0.000000e+00 : f32
      %54 = vector.broadcast %cst_35 : f32 to vector<8x1xf32>
      %c0_36 = arith.constant 0 : index
      %c0_37 = arith.constant 0 : index
      %55 = vector.load %arg8[%c0_36, %c0_37] : memref<8x1xf32, #tpu.memory_space<vmem>>, vector<8x1xf32>
      tpu.vector_store %arg8[%c0_36, %c0_37], %54 {strides = array<i32>} : memref<8x1xf32, #tpu.memory_space<vmem>>, vector<8x1xf32>,
    } else {
    }
    %c0 = arith.constant 0 : index
    %c0_1 = arith.constant 0 : index
    %c0_2 = arith.constant 0 : index
    %3 = vector.load %arg3[%c0, %c0_1, %c0_2] : memref<1x8x1xi32, #tpu.memory_space<vmem>>, vector<1x8x1xi32>
    %4 = vector.shape_cast %3 : vector<1x8x1xi32> to vector<8x1xi32>
    %c0_3 = arith.constant 0 : index
    %c0_4 = arith.constant 0 : index
    %c0_5 = arith.constant 0 : index
    %5 = vector.load %arg4[%c0_3, %c0_4, %c0_5] : memref<1x8x128xf32, #tpu.memory_space<vmem>>, vector<1x8x128xf32>
    %6 = vector.shape_cast %5 : vector<1x8x128xf32> to vector<8x128xf32>
    %c0_i32_6 = arith.constant 0 : i32
    %7 = vector.broadcast %c0_i32_6 : i32 to vector<8x1xi32>
    %8 = arith.cmpi sge, %4, %7 : vector<8x1xi32>
    %9 = tpu.iota {dimensions = array<i32: 1>} : vector<8x128xi32>
    %c128_i32 = arith.constant 128 : i32
    %10 = arith.muli %arg2, %c128_i32 : i32
    %11 = vector.broadcast %10 : i32 to vector<8x128xi32>
    %12 = arith.addi %9, %11 : vector<8x128xi32>
    %c128_i32_7 = arith.constant 128 : i32
    %13 = vector.broadcast %c128_i32_7 : i32 to vector<8x128xi32>
    %14 = arith.cmpi slt, %12, %13 : vector<8x128xi32>
    %cst = arith.constant 0xFF800000 : f32
    %15 = vector.broadcast %cst : f32 to vector<8x128xf32>
    %16 = arith.select %14, %6, %15 : vector<8x128xi1>, vector<8x128xf32>
    %cst_8 = arith.constant 0.000000e+00 : f32
    %17 = vector.shape_cast %8 : vector<8x1xi1> to vector<8x1xi1>
    %18 = vector.broadcast %17 : vector<8x1xi1> to vector<8x128xi1>
    %19 = vector.broadcast %cst_8 : f32 to vector<8x128xf32>
    %20 = arith.select %18, %16, %19 : vector<8x128xi1>, vector<8x128xf32>
    %cst_9 = arith.constant dense<0xFF800000> : vector<8xf32>
    %21 = vector.multi_reduction <maximumf>, %20, %cst_9 [1] : vector<8x128xf32> to vector<8xf32>
    %22 = vector.shape_cast %21 : vector<8xf32> to vector<8x1xf32>
    %c0_10 = arith.constant 0 : index
    %c0_11 = arith.constant 0 : index
    %23 = vector.load %arg6[%c0_10, %c0_11] : memref<8x1xf32, #tpu.memory_space<vmem>>, vector<8x1xf32>
    %24 = arith.maximumf %23, %22 : vector<8x1xf32>
    %c0_12 = arith.constant 0 : index
    %c0_13 = arith.constant 0 : index
    %25 = vector.load %arg6[%c0_12, %c0_13] : memref<8x1xf32, #tpu.memory_space<vmem>>, vector<8x1xf32>
    %26 = arith.subf %25, %24 : vector<8x1xf32>
    %27 = math.exp %26 : vector<8x1xf32>
    %c0_14 = arith.constant 0 : index
    %c0_15 = arith.constant 0 : index
    %28 = vector.load %arg7[%c0_14, %c0_15] : memref<8x1xf32, #tpu.memory_space<vmem>>, vector<8x1xf32>
    %29 = arith.mulf %27, %28 : vector<8x1xf32>
    %30 = vector.broadcast %24 : vector<8x1xf32> to vector<8x128xf32>
    %31 = arith.subf %20, %30 : vector<8x128xf32>
    %32 = math.exp %31 : vector<8x128xf32>
    %cst_16 = arith.constant dense<0.000000e+00> : vector<8xf32>
    %33 = vector.multi_reduction <add>, %32, %cst_16 [1] : vector<8x128xf32> to vector<8xf32>
    %34 = vector.shape_cast %33 : vector<8xf32> to vector<8x1xf32>
    %35 = arith.addf %29, %34 : vector<8x1xf32>
    %c0_17 = arith.constant 0 : index
    %c0_18 = arith.constant 0 : index
    %36 = vector.load %arg7[%c0_17, %c0_18] : memref<8x1xf32, #tpu.memory_space<vmem>>, vector<8x1xf32>
    tpu.vector_store %arg7[%c0_17, %c0_18], %35 {strides = array<i32>} : memref<8x1xf32, #tpu.memory_space<vmem>>, vector<8x1xf32>,
    %c0_19 = arith.constant 0 : index
    %c0_20 = arith.constant 0 : index
    %37 = vector.load %arg6[%c0_19, %c0_20] : memref<8x1xf32, #tpu.memory_space<vmem>>, vector<8x1xf32>
    tpu.vector_store %arg6[%c0_19, %c0_20], %24 {strides = array<i32>} : memref<8x1xf32, #tpu.memory_space<vmem>>, vector<8x1xf32>,
    %c0_21 = arith.constant 0 : index
    %c0_22 = arith.constant 0 : index
    %38 = vector.load %arg8[%c0_21, %c0_22] : memref<8x1xf32, #tpu.memory_space<vmem>>, vector<8x1xf32>
    %39 = vector.broadcast %4 : vector<8x1xi32> to vector<8x128xi32>
    %40 = arith.cmpi eq, %12, %39 : vector<8x128xi32>
    %cst_23 = arith.constant 0.000000e+00 : f32
    %41 = vector.broadcast %cst_23 : f32 to vector<8x128xf32>
    %42 = arith.select %40, %20, %41 : vector<8x128xi1>, vector<8x128xf32>
    %cst_24 = arith.constant dense<0.000000e+00> : vector<8xf32>
    %43 = vector.multi_reduction <add>, %42, %cst_24 [1] : vector<8x128xf32> to vector<8xf32>
    %44 = vector.shape_cast %43 : vector<8xf32> to vector<8x1xf32>
    %45 = arith.addf %38, %44 : vector<8x1xf32>
    %c0_25 = arith.constant 0 : index
    %c0_26 = arith.constant 0 : index
    %46 = vector.load %arg8[%c0_25, %c0_26] : memref<8x1xf32, #tpu.memory_space<vmem>>, vector<8x1xf32>
    tpu.vector_store %arg8[%c0_25, %c0_26], %45 {strides = array<i32>} : memref<8x1xf32, #tpu.memory_space<vmem>>, vector<8x1xf32>,
    %c0_i32_27 = arith.constant 0 : i32
    %47 = arith.cmpi eq, %arg2, %c0_i32_27 : i32
    %48 = arith.extui %47 : i1 to i32
    %c0_i32_28 = arith.constant 0 : i32
    %49 = arith.cmpi ne, %48, %c0_i32_28 : i32
    scf.if %49 {
      %50 = arith.extui %8 : vector<8x1xi1> to vector<8x1xi32>
      %51 = arith.sitofp %50 : vector<8x1xi32> to vector<8x1xf32>
      %c0_29 = arith.constant 0 : index
      %c0_30 = arith.constant 0 : index
      %52 = vector.load %arg6[%c0_29, %c0_30] : memref<8x1xf32, #tpu.memory_space<vmem>>, vector<8x1xf32>
      %c0_31 = arith.constant 0 : index
      %c0_32 = arith.constant 0 : index
      %53 = vector.load %arg7[%c0_31, %c0_32] : memref<8x1xf32, #tpu.memory_space<vmem>>, vector<8x1xf32>
      %54 = math.log %53 : vector<8x1xf32>
      %55 = arith.addf %52, %54 : vector<8x1xf32>
      %c0_33 = arith.constant 0 : index
      %c0_34 = arith.constant 0 : index
      %56 = vector.load %arg8[%c0_33, %c0_34] : memref<8x1xf32, #tpu.memory_space<vmem>>, vector<8x1xf32>
      %57 = arith.subf %55, %56 : vector<8x1xf32>
      %58 = arith.mulf %57, %51 : vector<8x1xf32>
      %c0_35 = arith.constant 0 : index
      %c0_36 = arith.constant 0 : index
      %c0_37 = arith.constant 0 : index
      %59 = vector.load %arg5[%c0_35, %c0_36, %c0_37] : memref<1x8x1xf32, #tpu.memory_space<vmem>>, vector<1x8x1xf32>
      %60 = vector.shape_cast %59 : vector<1x8x1xf32> to vector<8x1xf32>
      %61 = vector.shape_cast %58 : vector<8x1xf32> to vector<1x8x1xf32>
      tpu.vector_store %arg5[%c0_35, %c0_36, %c0_37], %61 {strides = array<i32>} : memref<1x8x1xf32, #tpu.memory_space<vmem>>, vector<1x8x1xf32>,
    } else {
    }
    return
  }
  func.func @transform_0(%arg0: i32, %arg1: i32, %arg2: i32) -> (i32, i32, i32) {
    %c0_i32 = arith.constant 0 : i32
    %c0_i32_0 = arith.constant 0 : i32
    return %arg0, %arg1, %c0_i32 : i32, i32, i32
  }
  func.func @transform_1(%arg0: i32, %arg1: i32, %arg2: i32) -> (i32, i32, i32) {
    %c0_i32 = arith.constant 0 : i32
    return %arg0, %arg1, %arg2 : i32, i32, i32
  }
  func.func @transform_2(%arg0: i32, %arg1: i32, %arg2: i32) -> (i32, i32, i32) {
    %c0_i32 = arith.constant 0 : i32
    %c0_i32_0 = arith.constant 0 : i32
    return %arg0, %arg1, %c0_i32 : i32, i32, i32
  }
}

</mosaic_0001>

<bundles_post_ra>
// kernel: gpt_lm_loss.1
= control target key start
LH: loop header
LB: loop body
LE: loop exit
PB: predicated region body
PF: predicated region fallthrough
CT: control target
= control target key end

     0   :  { %s469_s9 = smov 0   ;;  %s471_s10 = smov 0   ;;  %s517_s0 = inlined_call_operand.vmem [shape: s32[2,8,1], index: 0, kind: input, shape index: {}]   ;;  %s518_s1 = inlined_call_operand.vmem [shape: f32[2,8,128], index: 1, kind: input, shape index: {}]   ;;  %s519_s2 = inlined_call_operand.vmem [shape: f32[2,8,1], index: 2, kind: output, shape index: {}]  }
   0x1   :  { %s473_s11 = smov 0  }
   0x2 LB: > { %s31_s12 = sadd.s32 1, %s445_s10  ;;  %p385_p0 = scmp.ge.s32.totalorder %s449_s11, 1  ;;  %s449_s11 = sphi %s473_s11, %s12_s11   ;;  %s445_s10 = sphi %s471_s10, %s521_s10   ;;  %s441_s9 = sphi %s469_s9, %s520_s9  }
   0x3   : > { %p33_p1 = scmp.ge.s32.totalorder %s31_s12, 2  ;;  %p156_p2 = scmp.lt.s32.totalorder %s449_s11, 3 }
   0x5   : > { %s523_s12 = smov (%p33_p1, %s31_s12), 0  ;;  %p157_p3 = pnand %p385_p0, %p156_p2 }
   0x6   : > { %p192_p4 = scmp.lt.s32.totalorder (!%p157_p3), %s441_s9, 1 }
   0x7   : > { %160 = sbr.rel (%p157_p3) target bundleno = 521 (0x209), region = 28 }
   0xc   : > { %vm220_vm0 = vcmask 7168   ;;  %v451_v0 = vmov 0   ;;  %v452_v1 = vmov 0.0   ;;  %s525_s9 = smov (!%p192_p4, %s441_s9), 1  ;;  %v453_v5 = vmov -inf  }
   0xd   : > { %419 = vset.pattern.permute.xlu0 %v451_v0  ;;  %222 = vst.msk [vmem:[#allocation3] sm:$0xff] %vm220_vm0, %v452_v1  ;;  %420 = vset.pattern.permute.xlu1 %v451_v0  ;;  %s489_s13 = sshll.u32 %s525_s9, 3  ;;  %v227_v16 = vlaneseq }
   0xe   : > { %223 = vst.msk [vmem:[#allocation4] sm:$0xff] %vm220_vm0, %v452_v1  ;;  %s198_s16 = scalar_lea.vmem %s517_s0, %s489_s13  ;;  %s208_s19 = scalar_lea.vmem %s518_s1, %s489_s13 }
   0xf   : > { %v224_v2 = vld [vmem:[%s198_s16] sm:$0xff]  ;;  %221 = vst.msk [vmem:[#allocation2] sm:$0xff] %vm220_vm0, %v453_v5  ;;  %v228_v18 = vand.u32 127, %v227_v16  ;;  %s215_s22 = scalar_lea.vmem %s519_s2, %s489_s13 }
  0x10   : > { %vm226_vm1 = vcmp.ge.s32.totalorder %v224_v2, 0  ;;  %v225_v6 = vld [vmem:[%s208_s19] sm:$0xff] }
  0x11   : > { %v234_v3 = vsel %vm226_vm1, 1, %v451_v0  ;;  %v389_v4 = vsel %vm226_vm1, 1.0, %v452_v1 }
  0x12   : > { %236 = vperm.xlu0 %419, %v234_v3  }
  0x14   : > { %v247_v23 = vld [vmem:[#allocation3] sm:$0xff] }
  0x15   : > { %v263_v27 = vld [vmem:[#allocation4] sm:$0xff] }
  0x16   : > { %v242_v9 = vld [vmem:[#allocation2] sm:$0xff] }
  0x84   : > { %v237_v7 = vpop.permute.xlu0 %236 }
  0x85   : > { %vm238_vm2 = vcmp.eq.s32.totalorder %v237_v7, 1 }
  0x86   : > { %v239_v8 = vsel %vm238_vm2, %v225_v6, 0.0 }
  0x87   : > { %240 = vmax.xlane.f32.xlu0 %v239_v8 }
  0xfa   : > { %v241_v10 = vpop.xlane.xlu0 %240 }
  0xfb   : > { %v243_v11 = vmax.f32 %v242_v9, %v241_v10 }
  0xfd   : > { %v244_v12 = vsub.f32 %v242_v9, %v243_v11  ;;  %262 = vst.msk [vmem:[#allocation2] sm:$0xff] %vm220_vm0, %v243_v11  ;;  %251 = vperm.xlu1 %420, %v243_v11  }
  0xff   : > { %v245_v21 = vmul.f32 1.442695, %v244_v12 }
 0x104   : > { %v277_v33 = vld [vmem:[#allocation2] sm:$0xff] }
 0x105   : > { %265 = vperm.xlu1 %420, %v224_v2  }
 0x16f   : > { %v252_v13 = vpop.permute.xlu1 %251 }
 0x170   : > { %v254_v14 = vsub.f32 %v239_v8, %v252_v13 }
 0x172   : > { %v255_v15 = vmul.f32 1.442695, %v254_v14 }
 0x174   : > { %421 = vpow2.f32 %v255_v15 }
 0x175   : > { %423 = vpow2.f32 %v245_v21 }
 0x177   : > { %v266_v19 = vpop.permute.xlu1 %265 }
 0x178   : > { %vm267_vm3 = vcmp.eq.s32.totalorder %v228_v18, %v266_v19 }
 0x179   : > { %v268_v20 = vsel %vm267_vm3, %v239_v8, 0.0 }
 0x17a   : > { %v422_v17 = vpop.eup %421 }
 0x17b   : > { %257 = vadd.xlane.f32.xlu2 %v422_v17  ;;  %v424_v22 = vpop.eup %423 }
 0x17c   : > { %v248_v24 = vmul.f32 %v424_v22, %v247_v23 }
 0x183   : > { %269 = vadd.xlane.f32.xlu2 %v268_v20 }
 0x1ee   : > { %v258_v25 = vpop.xlane.xlu2 %257 }
 0x1ef   : > { %v259_v26 = vadd.f32 %v258_v25, %v248_v24 }
 0x1f1   : > { %261 = vst.msk [vmem:[#allocation3] sm:$0xff] %vm220_vm0, %v259_v26 }
 0x1f6   : > { %v270_v28 = vpop.xlane.xlu2 %269 }
 0x1f7   : > { %v271_v29 = vadd.f32 %v270_v28, %v263_v27 }
 0x1f8   : > { %v278_v30 = vld [vmem:[#allocation3] sm:$0xff] }
 0x1f9   : > { %425 = vlog2.f32 %v278_v30  ;;  %272 = vst.msk [vmem:[#allocation4] sm:$0xff] %vm220_vm0, %v271_v29 }
 0x1ff   : > { %v426_v31 = vpop.eup %425 }
 0x200   : > { %v280_v32 = vmul.f32 0.6931472, %v426_v31  ;;  %v282_v35 = vld [vmem:[#allocation4] sm:$0xff] }
 0x202   : > { %v281_v34 = vadd.f32 %v280_v32, %v277_v33 }
 0x204   : > { %v283_v36 = vsub.f32 %v281_v34, %v282_v35 }
 0x206   : > { %v284_v37 = vmul.f32 %v389_v4, %v283_v36 }
 0x208   : > { %285 = vst.msk [vmem:[%s215_s22] sm:$0xff] %vm220_vm0, %v284_v37 }
 0x209 PF: > { %s12_s11 = sadd.s32 1, %s449_s11   ;;  %s520_s9 = smov %s445_s10 }
 0x20a   : > { %p9_p5 = scmp.ge.s32.totalorder %s12_s11, 4   ;;  %s521_s10 = smov %s523_s12 }
 0x20c   :  { %11 = sbr.rel (!%p9_p5) target bundleno = 2 (0x2), region = 69 }

</bundles_post_ra>
